<compile_context>
chip_gen: v6e
topology: v6e:2x2x1
jax: 0.10.0
libtpu: 0.0.40
codegen_flags: <defaults>
</compile_context>

<pallas_src>
import jax
import jax.numpy as jnp
from jax.experimental import pallas as pl
from jax.experimental.pallas import tpu as pltpu

_LANE = 128


def _round_up(v, m):
    return (v + m - 1) // m * m


# ---------------------------------------------------------------------------
# Kernel (channel-major: refs are (C, tile_hw))
# ---------------------------------------------------------------------------
def _attention_block_kernel(g_ref, x_ref, wgT_ref, wxT_ref, b_ref, wp_ref,
                            bp_ref, out_ref):
    x = x_ref[...]                                        # (F_l, THW) io dtype
    # Both 1x1-conv branches (BN folded, biases combined) as one accumulation
    # chain so Mosaic can accumulate the second matmul into the MXU result
    # buffer (v7x MRB) instead of materializing g1/x1 and adding on the VPU.
    h = jnp.maximum(
        jnp.dot(wgT_ref[...], g_ref[...], preferred_element_type=jnp.float32)
        + jnp.dot(wxT_ref[...], x, preferred_element_type=jnp.float32)
        + b_ref[...],
        0.0)                                              # (F_int_p, THW) f32
    # psi: 1-output-channel 1x1 conv (+ folded BN) as a 1-row MXU matmul
    # (MXU has slack in this mem-bound kernel; psi stays lane-dense), then
    # sigmoid on the EUP.
    psi = jax.nn.sigmoid(
        jnp.dot(wp_ref[...], h, preferred_element_type=jnp.float32)
        + bp_ref[0])                                      # (1, THW) f32
    # Gate the skip connection; psi broadcasts over the channel (sublane) axis.
    # Multiply in the I/O dtype (bf16 on the fast path).
    out_ref[...] = (x * psi.astype(x.dtype)).astype(out_ref.dtype)


# ---------------------------------------------------------------------------
# Tile / VMEM sizing (generation-aware)
# ---------------------------------------------------------------------------
def _vmem_capacity_bytes():
    try:
        return int(pltpu.get_tpu_info().vmem_capacity_bytes)
    except Exception:
        return 64 * 1024 * 1024      # conservative: v7x per-TC VMEM


def _sublane_pad(c, itemsize):
    pack = 8 * max(1, 4 // max(1, itemsize))   # 8 rows for 4B, 16 for 2B
    return _round_up(max(c, 1), pack)


def _vmem_estimate(tile_hw, f_g, f_l, f_int_p, io_bytes):
    lane_hw = _round_up(tile_hw, _LANE)
    # double-buffered activation tiles (g, x in; out)
    act = 2 * lane_hw * (_sublane_pad(f_g, io_bytes)
                         + 2 * _sublane_pad(f_l, io_bytes)) * io_bytes
    # resident weights/biases (constant index_map, still 2 buffers each)
    weights = 2 * (f_int_p * (_round_up(f_g, _LANE) + _round_up(f_l, _LANE)) * io_bytes
                   + f_int_p * _LANE * 4          # (F_int_p, 1) bias, lane-padded
                   + 8 * f_int_p * 4)             # (1, F_int_p) psi row
    # f32 intermediates: two matmul results + h can be live simultaneously,
    # plus the psi row and the f32 staging of the output tile.
    scratch = lane_hw * (3 * f_int_p + _sublane_pad(f_l, 4) + 8) * 4
    return act + weights + scratch


def _choose_tile_hw(n, hw, f_g, f_l, f_int_p, io_bytes, budget):
    if hw <= _LANE:
        return hw                                 # full-HW block (legal, < 128 lanes)
    hw_cap = _round_up(hw, _LANE)
    tile = _LANE
    for cand in (8192, 4096, 2048, 1024, 512, 256, 128):
        cand = min(cand, hw_cap)
        if _vmem_estimate(cand, f_g, f_l, f_int_p, io_bytes) <= budget:
            tile = cand
            break
    # Megacore balance (v7x): aim for >= 4 total grid steps so both
    # TensorCores get work; no-op on single-TC chips / tiny inputs.
    while tile > _LANE and n * ((hw + tile - 1) // tile) < 4:
        tile = max(_LANE, (tile // 2) // _LANE * _LANE)
    return tile


# ---------------------------------------------------------------------------
# pallas_call wrapper (activations kept at true channel width in HBM)
# ---------------------------------------------------------------------------
def attention_block_pallas(g3, x3, wgT, wxT, b, wp_row, bp):
    """g3:(N,F_g,HW), x3:(N,F_l,HW) in the I/O dtype.  Returns (N,F_l,HW)."""
    n, f_g, hw = g3.shape
    f_l = x3.shape[1]
    f_int_p = wgT.shape[0]
    io_bytes = jnp.dtype(x3.dtype).itemsize

    cap = _vmem_capacity_bytes()
    budget = int(cap * 0.60)                      # ~77 MiB on v5e/v6e, ~38 MiB on v7x
    tile_hw = _choose_tile_hw(n, hw, f_g, f_l, f_int_p, io_bytes, budget)
    est = _vmem_estimate(tile_hw, f_g, f_l, f_int_p, io_bytes)
    vmem_limit = int(max(32 * 1024 * 1024,
                         min(est + (8 << 20), int(cap * 0.72))))

    grid = (n, pl.cdiv(hw, tile_hw))

    weight_bytes = int((wgT.size + wxT.size) * io_bytes
                       + (b.size + wp_row.size + bp.size) * 4)
    cost = pl.CostEstimate(
        flops=2 * n * hw * f_int_p * (f_g + f_l + 1),
        transcendentals=n * hw,
        bytes_accessed=n * hw * (f_g + 2 * f_l) * io_bytes + weight_bytes)

    const = lambda i, t: (0, 0)
    return pl.pallas_call(
        _attention_block_kernel,
        out_shape=jax.ShapeDtypeStruct((n, f_l, hw), x3.dtype),
        grid_spec=pltpu.PrefetchScalarGridSpec(
            num_scalar_prefetch=0,
            grid=grid,
            in_specs=[
                pl.BlockSpec((None, f_g, tile_hw), lambda i, t: (i, 0, t)),   # g
                pl.BlockSpec((None, f_l, tile_hw), lambda i, t: (i, 0, t)),   # x
                pl.BlockSpec((f_int_p, f_g), const),                          # W_g^T (folded)
                pl.BlockSpec((f_int_p, f_l), const),                          # W_x^T (folded)
                pl.BlockSpec((f_int_p, 1), const),                            # b_g + b_x
                pl.BlockSpec((1, f_int_p), const),                            # psi weight row
                pl.BlockSpec(memory_space=pltpu.MemorySpace.SMEM),            # psi bias scalar
            ],
            out_specs=pl.BlockSpec((None, f_l, tile_hw), lambda i, t: (i, 0, t)),
        ),
        compiler_params=pltpu.CompilerParams(
            dimension_semantics=("parallel", "parallel"),
            vmem_limit_bytes=vmem_limit),
        cost_estimate=cost,
    )(g3, x3, wgT, wxT, b, wp_row, bp)


# ---------------------------------------------------------------------------
# Parameter prep (BN folding + F_int padding of VMEM-resident weights)
# ---------------------------------------------------------------------------
def fold_bn_into_conv(w, b, gamma, beta, mean, var, eps=1e-5):
    """w:(Cin,Cout), b:(Cout,) -> folded (w,b) so BN(conv(x)) == x @ w_f + b_f."""
    scale = gamma / jnp.sqrt(var + eps)
    return w * scale[None, :], (b - mean) * scale + beta


def _prepare_params(params, io_dtype):
    wg, bg = fold_bn_into_conv(params["wg"], params["bg"], *params["bn_g"])
    wx, bx = fold_bn_into_conv(params["wx"], params["bx"], *params["bn_x"])
    wp, bp = fold_bn_into_conv(params["wp"], params["bp"], *params["bn_p"])
    f_g, f_int = wg.shape
    f_l = wx.shape[0]
    f_int_p = _round_up(f_int, _LANE)
    # Zero-padding of the F_int axis is exact: padded rows carry zero weight
    # and bias -> h == 0 there, and the zero psi-weight entries contribute 0.
    wgT = jnp.zeros((f_int_p, f_g), jnp.float32).at[:f_int, :].set(wg.T)
    wxT = jnp.zeros((f_int_p, f_l), jnp.float32).at[:f_int, :].set(wx.T)
    b = jnp.zeros((f_int_p, 1), jnp.float32).at[:f_int, 0].set(bg + bx)
    wp_row = jnp.zeros((1, f_int_p), jnp.float32).at[0, :f_int].set(wp[:, 0])
    return (wgT.astype(io_dtype), wxT.astype(io_dtype), b, wp_row,
            bp.reshape(1).astype(jnp.float32))


def attention_block_forward(g, x, params, io_dtype=jnp.bfloat16):
    """NCHW forward (PyTorch convention), transpose-free.  Equivalent to the
    PyTorch module in eval (running-stats BatchNorm) mode.  Output is in the
    I/O dtype (bf16 on the fast path)."""
    n, f_g, h, w = g.shape
    f_l = x.shape[1]
    wgT, wxT, b, wp_row, bp = _prepare_params(params, io_dtype)
    g3 = g.reshape(n, f_g, h * w).astype(io_dtype)    # free reshape (NCHW contiguous)
    x3 = x.reshape(n, f_l, h * w).astype(io_dtype)
    out3 = attention_block_pallas(g3, x3, wgT, wxT, b, wp_row, bp)
    return out3.reshape(n, f_l, h, w)


def attention_block_reference(g, x, params):
    """Pure-JAX f32 reference with identical semantics (for verification)."""
    wg, bg = fold_bn_into_conv(params["wg"], params["bg"], *params["bn_g"])
    wx, bx = fold_bn_into_conv(params["wx"], params["bx"], *params["bn_x"])
    wp, bp = fold_bn_into_conv(params["wp"], params["bp"], *params["bn_p"])
    hi = jax.lax.Precision.HIGHEST
    g_n = jnp.transpose(g, (0, 2, 3, 1))
    x_n = jnp.transpose(x, (0, 2, 3, 1))
    g1 = jnp.einsum("nhwc,cf->nhwf", g_n, wg, precision=hi) + bg
    x1 = jnp.einsum("nhwc,cf->nhwf", x_n, wx, precision=hi) + bx
    h = jnp.maximum(g1 + x1, 0.0)
    psi = jax.nn.sigmoid(jnp.einsum("nhwf,fo->nhwo", h, wp, precision=hi) + bp)
    out = x_n * psi
    return jnp.transpose(out, (0, 3, 1, 2))


if __name__ == "__main__":
    # Small shapes consistent with the module's forward.
    N, F_g, F_l, F_int, H, W = 2, 4, 4, 8, 16, 16

    key = jax.random.PRNGKey(0)
    ks = jax.random.split(key, 12)

    params = {
        # conv weights stored as (Cin, Cout); biases (Cout,)
        "wg": jax.random.normal(ks[0], (F_g, F_int), jnp.float32) * 0.1,
        "bg": jax.random.normal(ks[1], (F_int,), jnp.float32) * 0.1,
        "wx": jax.random.normal(ks[2], (F_l, F_int), jnp.float32) * 0.1,
        "bx": jax.random.normal(ks[3], (F_int,), jnp.float32) * 0.1,
        "wp": jax.random.normal(ks[4], (F_int, 1), jnp.float32) * 0.1,
        "bp": jax.random.normal(ks[5], (1,), jnp.float32) * 0.1,
        # BatchNorm params: (gamma, beta, running_mean, running_var)
        "bn_g": (jnp.ones((F_int,), jnp.float32) + 0.05 * jax.random.normal(ks[6], (F_int,)),
                 0.05 * jax.random.normal(ks[7], (F_int,)),
                 jnp.zeros((F_int,), jnp.float32),
                 jnp.ones((F_int,), jnp.float32)),
        "bn_x": (jnp.ones((F_int,), jnp.float32) + 0.05 * jax.random.normal(ks[8], (F_int,)),
                 0.05 * jax.random.normal(ks[9], (F_int,)),
                 jnp.zeros((F_int,), jnp.float32),
                 jnp.ones((F_int,), jnp.float32)),
        "bn_p": (jnp.ones((1,), jnp.float32),
                 jnp.zeros((1,), jnp.float32),
                 jnp.zeros((1,), jnp.float32),
                 jnp.ones((1,), jnp.float32)),
    }

    g_in = jax.random.normal(ks[10], (N, F_g, H, W), jnp.float32)
    x_in = jax.random.normal(ks[11], (N, F_l, H, W), jnp.float32)

    ref = attention_block_reference(g_in, x_in, params)

    # f32 I/O path: tight check against the pure-JAX reference.
    out_f32 = attention_block_forward(g_in, x_in, params, io_dtype=jnp.float32)
    out_f32 = jax.block_until_ready(out_f32)
    assert out_f32.shape == (N, F_l, H, W)
    assert jnp.allclose(out_f32, ref, atol=2e-3, rtol=2e-3), "f32 mismatch vs reference"

    # bf16 I/O path (default, halves HBM traffic): loose tolerance.
    out_bf16 = attention_block_forward(g_in, x_in, params, io_dtype=jnp.bfloat16)
    out_bf16 = jax.block_until_ready(out_bf16)
    assert out_bf16.shape == (N, F_l, H, W)
    assert jnp.allclose(out_bf16.astype(jnp.float32), ref, atol=1e-1, rtol=1e-1), \
        "bf16 mismatch vs reference"

    print("KERNEL_OK")
</pallas_src>

<mosaic_0001>
module attributes {stable_mosaic.version = 11 : i64} {
  func.func @_attention_block_kernel(%arg0: i32, %arg1: i32, %arg2: memref<1x4x128xf32, #tpu.memory_space<vmem>>, %arg3: memref<1x4x128xf32, #tpu.memory_space<vmem>>, %arg4: memref<128x4xf32, #tpu.memory_space<vmem>>, %arg5: memref<128x4xf32, #tpu.memory_space<vmem>>, %arg6: memref<128x1xf32, #tpu.memory_space<vmem>>, %arg7: memref<1x128xf32, #tpu.memory_space<vmem>>, %arg8: memref<1xf32, #tpu.memory_space<smem>>, %arg9: memref<1x4x128xf32, #tpu.memory_space<vmem>>) attributes {dimension_semantics = [#tpu.dimension_semantics<parallel>, #tpu.dimension_semantics<parallel>], iteration_bounds = array<i64: 2, 2>, scalar_prefetch = 0 : i64, scratch_operands = 0 : i64, tpu.core_type = #tpu.core_type<tc>, window_params = [{transform_indices = @transform_0, window_bounds = array<i64: 1, 4, 128>}, {transform_indices = @transform_1, window_bounds = array<i64: 1, 4, 128>}, {pipeline_mode = #tpu.pipeline_mode<synchronous>, transform_indices = @transform_2, window_bounds = array<i64: 128, 4>}, {pipeline_mode = #tpu.pipeline_mode<synchronous>, transform_indices = @transform_3, window_bounds = array<i64: 128, 4>}, {pipeline_mode = #tpu.pipeline_mode<synchronous>, transform_indices = @transform_4, window_bounds = array<i64: 128, 1>}, {pipeline_mode = #tpu.pipeline_mode<synchronous>, transform_indices = @transform_5, window_bounds = array<i64: 1, 128>}, {transform_indices = @transform_6, window_bounds = array<i64: 1>}, {transform_indices = @transform_7, window_bounds = array<i64: 1, 4, 128>}]} {
    %c0 = arith.constant 0 : index
    %c0_0 = arith.constant 0 : index
    %c0_1 = arith.constant 0 : index
    %0 = vector.load %arg3[%c0, %c0_0, %c0_1] : memref<1x4x128xf32, #tpu.memory_space<vmem>>, vector<1x4x128xf32>
    %1 = vector.shape_cast %0 : vector<1x4x128xf32> to vector<4x128xf32>
    %c0_2 = arith.constant 0 : index
    %c0_3 = arith.constant 0 : index
    %2 = vector.load %arg4[%c0_2, %c0_3] : memref<128x4xf32, #tpu.memory_space<vmem>>, vector<128x4xf32>
    %c0_4 = arith.constant 0 : index
    %c0_5 = arith.constant 0 : index
    %c0_6 = arith.constant 0 : index
    %3 = vector.load %arg2[%c0_4, %c0_5, %c0_6] : memref<1x4x128xf32, #tpu.memory_space<vmem>>, vector<1x4x128xf32>
    %4 = vector.shape_cast %3 : vector<1x4x128xf32> to vector<4x128xf32>
    %cst = arith.constant dense<0.000000e+00> : vector<128x128xf32>
    %5 = tpu.matmul %2, %4, %cst {dimension_numbers = #tpu.dot_dimension_numbers<[1], [0], [0], [1], [0, 0, 1, 1], [], []>} : vector<128x4xf32>, vector<4x128xf32>, vector<128x128xf32> -> vector<128x128xf32>
    %c0_7 = arith.constant 0 : index
    %c0_8 = arith.constant 0 : index
    %6 = vector.load %arg5[%c0_7, %c0_8] : memref<128x4xf32, #tpu.memory_space<vmem>>, vector<128x4xf32>
    %cst_9 = arith.constant dense<0.000000e+00> : vector<128x128xf32>
    %7 = tpu.matmul %6, %1, %cst_9 {dimension_numbers = #tpu.dot_dimension_numbers<[1], [0], [0], [1], [0, 0, 1, 1], [], []>} : vector<128x4xf32>, vector<4x128xf32>, vector<128x128xf32> -> vector<128x128xf32>
    %8 = arith.addf %5, %7 : vector<128x128xf32>
    %c0_10 = arith.constant 0 : index
    %c0_11 = arith.constant 0 : index
    %9 = vector.load %arg6[%c0_10, %c0_11] : memref<128x1xf32, #tpu.memory_space<vmem>>, vector<128x1xf32>
    %10 = vector.broadcast %9 : vector<128x1xf32> to vector<128x128xf32>
    %11 = arith.addf %8, %10 : vector<128x128xf32>
    %cst_12 = arith.constant 0.000000e+00 : f32
    %12 = vector.broadcast %cst_12 : f32 to vector<128x128xf32>
    %13 = arith.maximumf %11, %12 : vector<128x128xf32>
    %c0_13 = arith.constant 0 : index
    %c0_14 = arith.constant 0 : index
    %14 = vector.load %arg7[%c0_13, %c0_14] : memref<1x128xf32, #tpu.memory_space<vmem>>, vector<1x128xf32>
    %cst_15 = arith.constant dense<0.000000e+00> : vector<1x128xf32>
    %15 = tpu.matmul %14, %13, %cst_15 {dimension_numbers = #tpu.dot_dimension_numbers<[1], [0], [0], [1], [0, 0, 1, 1], [], []>} : vector<1x128xf32>, vector<128x128xf32>, vector<1x128xf32> -> vector<1x128xf32>
    %c0_16 = arith.constant 0 : index
    %16 = memref.load %arg8[%c0_16] : memref<1xf32, #tpu.memory_space<smem>>
    %17 = vector.broadcast %16 : f32 to vector<1x128xf32>
    %18 = arith.addf %15, %17 : vector<1x128xf32>
    %19 = arith.negf %18 : vector<1x128xf32>
    %20 = math.exp %19 : vector<1x128xf32>
    %cst_17 = arith.constant 1.000000e+00 : f32
    %21 = vector.broadcast %cst_17 : f32 to vector<1x128xf32>
    %22 = arith.addf %21, %20 : vector<1x128xf32>
    %23 = arith.divf %21, %22 : vector<1x128xf32>
    %24 = vector.broadcast %23 : vector<1x128xf32> to vector<4x128xf32>
    %25 = arith.mulf %1, %24 : vector<4x128xf32>
    %c0_18 = arith.constant 0 : index
    %c0_19 = arith.constant 0 : index
    %c0_20 = arith.constant 0 : index
    %26 = vector.load %arg9[%c0_18, %c0_19, %c0_20] : memref<1x4x128xf32, #tpu.memory_space<vmem>>, vector<1x4x128xf32>
    %27 = vector.shape_cast %26 : vector<1x4x128xf32> to vector<4x128xf32>
    %28 = vector.shape_cast %25 : vector<4x128xf32> to vector<1x4x128xf32>
    tpu.vector_store %arg9[%c0_18, %c0_19, %c0_20], %28 {strides = array<i32>} : memref<1x4x128xf32, #tpu.memory_space<vmem>>, vector<1x4x128xf32>,
    return
  }
  func.func @transform_0(%arg0: i32, %arg1: i32) -> (i32, i32, i32) {
    %c0_i32 = arith.constant 0 : i32
    %c0_i32_0 = arith.constant 0 : i32
    return %arg0, %c0_i32, %arg1 : i32, i32, i32
  }
  func.func @transform_1(%arg0: i32, %arg1: i32) -> (i32, i32, i32) {
    %c0_i32 = arith.constant 0 : i32
    %c0_i32_0 = arith.constant 0 : i32
    return %arg0, %c0_i32, %arg1 : i32, i32, i32
  }
  func.func @transform_2(%arg0: i32, %arg1: i32) -> (i32, i32) {
    %c0_i32 = arith.constant 0 : i32
    %c0_i32_0 = arith.constant 0 : i32
    %c0_i32_1 = arith.constant 0 : i32
    return %c0_i32, %c0_i32_0 : i32, i32
  }
  func.func @transform_3(%arg0: i32, %arg1: i32) -> (i32, i32) {
    %c0_i32 = arith.constant 0 : i32
    %c0_i32_0 = arith.constant 0 : i32
    %c0_i32_1 = arith.constant 0 : i32
    return %c0_i32, %c0_i32_0 : i32, i32
  }
  func.func @transform_4(%arg0: i32, %arg1: i32) -> (i32, i32) {
    %c0_i32 = arith.constant 0 : i32
    %c0_i32_0 = arith.constant 0 : i32
    %c0_i32_1 = arith.constant 0 : i32
    return %c0_i32, %c0_i32_0 : i32, i32
  }
  func.func @transform_5(%arg0: i32, %arg1: i32) -> (i32, i32) {
    %c0_i32 = arith.constant 0 : i32
    %c0_i32_0 = arith.constant 0 : i32
    %c0_i32_1 = arith.constant 0 : i32
    return %c0_i32, %c0_i32_0 : i32, i32
  }
  func.func @transform_6(%arg0: i32, %arg1: i32) -> i32 {
    %c0_i32 = arith.constant 0 : i32
    %c0_i32_0 = arith.constant 0 : i32
    return %c0_i32 : i32
  }
  func.func @transform_7(%arg0: i32, %arg1: i32) -> (i32, i32, i32) {
    %c0_i32 = arith.constant 0 : i32
    %c0_i32_0 = arith.constant 0 : i32
    return %arg0, %c0_i32, %arg1 : i32, i32, i32
  }
}

</mosaic_0001>

<bundles_post_ra>
// kernel: tpu_custom_call.1
= control target key start
LH: loop header
LB: loop body
LE: loop exit
PB: predicated region body
PF: predicated region fallthrough
CT: control target
= control target key end

     0   :  { %s1860_s0 = inlined_call_operand.vmem [shape: f32[2,4,256], index: 0, kind: input, shape index: {}]   ;;  %s1861_s1 = inlined_call_operand.vmem [shape: f32[2,4,256], index: 1, kind: input, shape index: {}]   ;;  %s1862_s2 = inlined_call_operand.vmem [shape: f32[128,4], index: 2, kind: input, shape index: {}]   ;;  %s1863_s3 = inlined_call_operand.vmem [shape: f32[128,4], index: 3, kind: input, shape index: {}]   ;;  %s1864_s4 = inlined_call_operand.vmem [shape: f32[128,1], index: 4, kind: input, shape index: {}]   ;;  %s1865_s5 = inlined_call_operand.vmem [shape: f32[1,128], index: 5, kind: input, shape index: {}]   ;;  %s1866_s6 = inlined_call_operand.<no memory space> [shape: f32[1], index: 6, kind: input, shape index: {}]   ;;  %s1867_s7 = inlined_call_operand.hbm [shape: f32[2,4,256], index: 7, kind: output, shape index: {}]  }
   0x1   :  { %12 = sst [smem:[#allocation2]] %s1866_s6 }
   0x2   :  { %13 = vsyncpa [#allocation4], 0 }
   0x3   :  { %15 = vsyncpa [#allocation4 + $0x1], 0  ;;  %s1496_s26 = smov 0   ;;  %s1498_s27 = smov 0  }
   0x4   :  { %s1500_s28 = smov 0   ;;  %s1502_s29 = smov 0  }
   0x5   :  { %s1504_s30 = smov 0   ;;  %s1506_s8 = smov 0  }
   0x6   :  { %s1508_s9 = smov 0   ;;  %s1510_s10 = smov 0  }
   0x7 LB: > { %1871 = sst [smem:[#allocation6_spill]] %s1443_s9  ;;  %s1087_s6 = sadd.s32 4294967295, %s1447_s10   ;;  %s1447_s10 = sphi %s1510_s10, %s21_s10   ;;  %s1443_s9 = sphi %s1508_s9, %s1878_s9   ;;  %s1439_s8 = sphi %s1506_s8, %s1883_s8   ;;  %s1435_s30 = sphi %s1504_s30, %s1876_s30   ;;  %s1431_s29 = sphi %s1502_s29, %s1882_s29   ;;  %s1427_s28 = sphi %s1500_s28, %s1881_s28   ;;  %s1423_s27 = sphi %s1498_s27, %s1880_s27   ;;  %s1419_s26 = sphi %s1496_s26, %s1879_s26  }
   0x8   : > { %s1088_s11 = sadd.s32 4294967294, %s1447_s10   ;;  %s30_s12 = sadd.s32 1, %s1439_s8 }
   0x9   : > { %p31_p0 = scmp.ge.s32.totalorder %s30_s12, 2  ;;  %s33_s13 = sadd.s32 1, %s1443_s9 }
   0xa   : > { %p213_p1 = scmp.ne.s32.totalorder %s1427_s28, %s1423_s27  ;;  %p214_p2 = scmp.eq.s32.totalorder %s1087_s6, 3 }
   0xb   : > { %s1885_s12 = smov (%p31_p0, %s30_s12), 0  ;;  %s1887_s13 = smov (!%p31_p0, %s33_s13), %s1443_s9 }
   0xc   : > { %1872 = sst [smem:[#allocation7_spill]] %s1885_s12  ;;  %s199_s14 = ssub.s32 %s1439_s8, %s1885_s12 }
   0xd   : > { %p1547_p3 = por %p214_p2, %p213_p1  ;;  %p35_p4 = scmp.ge.s32.totalorder %s1887_s13, 2 }
   0xe   : > { %p219_p5 = scmp.ne.s32.totalorder %s1423_s27, %s1419_s26  ;;  %p220_p6 = scmp.eq.s32.totalorder %s1088_s11, 3 }
   0xf   : > { %p1091_p7 = scmp.ge.s32.totalorder %s1447_s10, 1  ;;  %s1889_s13 = smov (%p35_p4, %s1887_s13), 0 }
  0x10   : > { %1874 = sst [smem:[#allocation8_spill]] %s1889_s13  ;;  %p1556_p8 = por %p220_p6, %p219_p5 }
  0x11   : > { %p275_p9 = scmp.lt.s32.totalorder %s1447_s10, 5  ;;  %s198_s17 = ssub.s32 %s1443_s9, %s1889_s13 }
  0x12   : > { %s203_s18 = sadd.s32 1, %s1427_s28  ;;  %s200_s19 = sor.u32 %s199_s14, %s198_s17 }
  0x13   : > { %p276_p10 = pnand %p1091_p7, %p275_p9  ;;  %p201_p11 = scmp.eq.s32.totalorder %s200_s19, 0 }
  0x14   : > { %p318_p12 = scmp.lt.s32.totalorder (!%p276_p10), %s1435_s30, 1  ;;  %p320_p13 = scmp.lt.s32.totalorder (!%p276_p10), %s1431_s29, 1 }
  0x15   : > { %s1565_s20 = scalar_select %p201_p11, %s1427_s28, %s203_s18  }
  0x16   : > { %279 = sbr.rel (%p276_p10) target bundleno = 539 (0x21b), region = 48  ;;  %s891_s13 = sld [smem:[#allocation2]] (!%p276_p10) }
  0x17   : > { %s315_s18 = sand.u32 (!%p276_p10), 1, %s1423_s27  }
  0x18   : > { %s1092_s19 = sshll.u32 (!%p276_p10), %s315_s18, 2 }
  0x1b   : > { %v352_v0 = vld [vmem:[%s1863_s3] sm:$0xff]  ;;  %vm368_vm0 = vcmask 31744   ;;  %s319_s25 = scalar_select %p318_p12, %s1435_s30, 1  ;;  %v1449_v2 = vmov 0   ;;  %vm417_vm1 = vcmask 1043456   ;;  %v353_v3 = vld [vmem:[%s1863_s3 + $0x8] sm:$0xff] }
  0x1c   : > { %v335_v1 = vld [vmem:[%s1862_s2] sm:$0xff]  ;;  %1190 = vmatprep.mubr.msk.f32.mxu0 %vm368_vm0, %v352_v0  ;;  %1349 = vset.pattern.permute.xlu0 %v1449_v2  ;;  %s321_s6 = scalar_select %p320_p13, %s1431_s29, 1  ;;  %v336_v6 = vld [vmem:[%s1862_s2 + $0x8] sm:$0xff]  ;;  %v354_v7 = vld [vmem:[%s1863_s3 + $0x10] sm:$0xff]  ;;  %v1450_v51 = vmov 0.0   ;;  %vm1451_vm2 = vmmov 0  }
  0x1d   : > { %1216 = vmatprep.mubr.msk.f32.mxu1 %vm368_vm0, %v335_v1  ;;  %1350 = vset.pattern.permute.xlu1 %v1449_v2  ;;  %s1093_s11 = sshll.u32 %s319_s25, 1  ;;  %v337_v8 = vld [vmem:[%s1862_s2 + $0x10] sm:$0xff]  ;;  %v777_v9 = vld [vmem:[%s1864_s4 + $0x78] sm:$0xff]  ;;  %v775_v12 = vld [vmem:[%s1864_s4 + $0x68] sm:$0xff] }
  0x1e   : > { %s323_s14 = sadd.s32 %s1093_s11, %s321_s6  ;;  %v355_v10 = vld [vmem:[%s1863_s3 + $0x18] sm:$0xff]  ;;  %v356_v13 = vld [vmem:[%s1863_s3 + $0x20] sm:$0xff]  ;;  %855 = vperm.xlu0 %1349, %v777_v9   ;;  %845 = vperm.xlu1 %1350, %v775_v12   ;;  %v776_v15 = vld [vmem:[%s1864_s4 + $0x70] sm:$0xff] }
  0x1f   : > { %s1094_s17 = sshll.u32 %s323_s14, 2  ;;  %v338_v11 = vld [vmem:[%s1862_s2 + $0x18] sm:$0xff]  ;;  %v339_v14 = vld [vmem:[%s1862_s2 + $0x20] sm:$0xff]  ;;  %v357_v17 = vld [vmem:[%s1863_s3 + $0x28] sm:$0xff] }
  0x20   : > { %s333_s21 = scalar_lea.vmem %s1861_s1, %s1094_s17  ;;  %s325_s24 = scalar_lea.vmem %s1860_s0, %s1094_s17  ;;  %v774_v16 = vld [vmem:[%s1864_s4 + $0x60] sm:$0xff]  ;;  %v340_v18 = vld [vmem:[%s1862_s2 + $0x28] sm:$0xff]  ;;  %v358_v19 = vld [vmem:[%s1863_s3 + $0x30] sm:$0xff] }
  0x21   : > { %v1588_v4 = vld [vmem:[%s333_s21] sm:$0xf]  ;;  %v341_v20 = vld [vmem:[%s1862_s2 + $0x30] sm:$0xff]  ;;  %v773_v21 = vld [vmem:[%s1864_s4 + $0x58] sm:$0xff]  ;;  %s1133_s21 = sshll.u32 %s1435_s30, 1  ;;  %s976_s17 = scalar_lea.sflag [#allocation4], %s315_s18 }
  0x22   : > { %v351_v5 = vld [vmem:[%s325_s24] sm:$0xf]  ;;  %1188 = vmatprep.subr.msk.mxu0 %vm417_vm1, %v1588_v4  ;;  %850 = vperm.xlu0 %1349, %v776_v15   ;;  %v772_v22 = vld [vmem:[%s1864_s4 + $0x50] sm:$0xff]  ;;  %v359_v23 = vld [vmem:[%s1863_s3 + $0x38] sm:$0xff]  ;;  %s987_s22 = sadd.s32 %s1431_s29, %s1133_s21  ;;  %s317_s24 = scalar_lea.vmem [#allocation3], %s1092_s19 }
  0x23   : > { %1214 = vmatprep.subr.msk.mxu1 %vm417_vm1, %v351_v5  ;;  %1189 = vmatpush3.msk.msra.mxu0 %vm417_vm1, %v1588_v4  ;;  %v342_v24 = vld [vmem:[%s1862_s2 + $0x38] sm:$0xff]  ;;  %v360_v25 = vld [vmem:[%s1863_s3 + $0x40] sm:$0xff]  ;;  %v771_v27 = vld [vmem:[%s1864_s4 + $0x48] sm:$0xff]  ;;  %s1134_s23 = sshll.u32 %s987_s22, 6  ;;  %s991_s25 = sshll.u32 %s317_s24, 4  ;;  %s992_s25 = int_to_ptr.vmem [resolvable:$true] %s991_s25 }
  0x24   : > { %1215 = vmatpush3.msk.msra.mxu1 %vm417_vm1, %v351_v5  ;;  %1191 = vmatmul.mubr.msk.f32.vlgmr.msra.gmra.mxu0 %vm368_vm0, %v353_v3  ;;  %v343_v26 = vld [vmem:[%s1862_s2 + $0x40] sm:$0xff]  ;;  %v361_v29 = vld [vmem:[%s1863_s3 + $0x48] sm:$0xff]  ;;  %v362_v31 = vld [vmem:[%s1863_s3 + $0x50] sm:$0xff]  ;;  %s989_s14 = scalar_lea.hbm %s1867_s7, %s1134_s23  ;;  %s1355_s9 = scalar_lea.vmem %s992_s25, 64 }
  0x25   : > { %1217 = vmatmul.mubr.msk.f32.vlgmr.msra.gmra.mxu1 %vm368_vm0, %v336_v6  ;;  %1193 = vmatprep.mubr.msk.f32.mxu0 %vm368_vm0, %v354_v7  ;;  %v770_v28 = vld [vmem:[%s1864_s4 + $0x40] sm:$0xff]  ;;  %v344_v30 = vld [vmem:[%s1862_s2 + $0x48] sm:$0xff]  ;;  %v345_v32 = vld [vmem:[%s1862_s2 + $0x50] sm:$0xff]  ;;  %p1356_p0 = scmp.ne.s32.totalorder %s992_s25, %s1355_s9  ;;  %s1452_s29 = smov [#allocation3]  }
  0x26   : > { %1219 = vmatprep.mubr.msk.f32.mxu1 %vm368_vm0, %v337_v8  ;;  %840 = vperm.xlu1 %1350, %v774_v16   ;;  %v769_v33 = vld [vmem:[%s1864_s4 + $0x38] sm:$0xff]  ;;  %v768_v34 = vld [vmem:[%s1864_s4 + $0x30] sm:$0xff]  ;;  %v364_v37 = vld [vmem:[%s1863_s3 + $0x60] sm:$0xff]  ;;  %s1359_s30 = sshll.u32 %s1452_s29, 4  ;;  %s1360_s30 = int_to_ptr.vmem [resolvable:$false] %s1359_s30 }
  0x27   : > { %835 = vperm.xlu0 %1349, %v773_v21   ;;  %v363_v35 = vld [vmem:[%s1863_s3 + $0x58] sm:$0xff]  ;;  %v347_v38 = vld [vmem:[%s1862_s2 + $0x60] sm:$0xff]  ;;  %v767_v39 = vld [vmem:[%s1864_s4 + $0x28] sm:$0xff]  ;;  %1240 = vmatprep.subr.mxu0 %v1450_v51  ;;  %p1357_p1 = pnand %p1356_p0, %p1547_p3  ;;  %s1361_s12 = scalar_lea.vmem %s1360_s30, 128 }
  0x28   : > { %1194 = vmatmul.mubr.msk.f32.gmra.mxu0 %vm368_vm0, %v355_v10  ;;  %v346_v36 = vld [vmem:[%s1862_s2 + $0x58] sm:$0xff]  ;;  %v766_v40 = vld [vmem:[%s1864_s4 + $0x20] sm:$0xff]  ;;  %v365_v41 = vld [vmem:[%s1863_s3 + $0x68] sm:$0xff]  ;;  %p1362_p4 = scmp.lt.s32.totalorder %s992_s25, %s1360_s30  ;;  %p1363_p5 = scmp.lt.s32.totalorder %s1361_s12, %s1355_s9 }
  0x29   : > { %1220 = vmatmul.mubr.msk.f32.gmra.mxu1 %vm368_vm0, %v338_v11  ;;  %1196 = vmatprep.mubr.msk.f32.mxu0 %vm368_vm0, %v356_v13  ;;  %v348_v42 = vld [vmem:[%s1862_s2 + $0x68] sm:$0xff]  ;;  %v366_v43 = vld [vmem:[%s1863_s3 + $0x70] sm:$0xff]  ;;  %v765_v45 = vld [vmem:[%s1864_s4 + $0x18] sm:$0xff]  ;;  %p1358_p2 = pneg %p1357_p1 }
  0x2a   : > { %1222 = vmatprep.mubr.msk.f32.mxu1 %vm368_vm0, %v339_v14  ;;  %830 = vperm.xlu1 %1350, %v772_v22   ;;  %v349_v44 = vld [vmem:[%s1862_s2 + $0x70] sm:$0xff]  ;;  %v367_v47 = vld [vmem:[%s1863_s3 + $0x78] sm:$0xff]  ;;  %v763_v49 = vld [vmem:[%s1864_s4 + $0x8] sm:$0xff]  ;;  %p1364_p6 = por %p1363_p5, %p1362_p4 }
  0x2b   : > { %825 = vperm.xlu0 %1349, %v771_v27   ;;  %v764_v46 = vld [vmem:[%s1864_s4 + $0x10] sm:$0xff]  ;;  %v350_v48 = vld [vmem:[%s1862_s2 + $0x78] sm:$0xff]  ;;  %v762_v50 = vld [vmem:[%s1864_s4] sm:$0xff] }
  0x2c   : > { %1197 = vmatmul.mubr.msk.f32.gmra.mxu0 %vm368_vm0, %v357_v17  ;;  %p1365_p7 = pnand %p1364_p6, %p1358_p2 }
  0x2d   : > { %1223 = vmatmul.mubr.msk.f32.gmra.mxu1 %vm368_vm0, %v340_v18  ;;  %1199 = vmatprep.mubr.msk.f32.mxu0 %vm368_vm0, %v358_v19 }
  0x2e   : > { %1225 = vmatprep.mubr.msk.f32.mxu1 %vm368_vm0, %v341_v20  ;;  %820 = vperm.xlu1 %1350, %v770_v28  }
  0x2f   : > { %815 = vperm.xlu0 %1349, %v769_v33  }
  0x30   : > { %1200 = vmatmul.mubr.msk.f32.gmra.mxu0 %vm368_vm0, %v359_v23 }
  0x31   : > { %1226 = vmatmul.mubr.msk.f32.gmra.mxu1 %vm368_vm0, %v342_v24  ;;  %1202 = vmatprep.mubr.msk.f32.mxu0 %vm368_vm0, %v360_v25 }
  0x32   : > { %1228 = vmatprep.mubr.msk.f32.mxu1 %vm368_vm0, %v343_v26  ;;  %810 = vperm.xlu1 %1350, %v768_v34  }
  0x33   : > { %805 = vperm.xlu0 %1349, %v767_v39  }
  0x34   : > { %1203 = vmatmul.mubr.msk.f32.gmra.mxu0 %vm368_vm0, %v361_v29 }
  0x35   : > { %1229 = vmatmul.mubr.msk.f32.gmra.mxu1 %vm368_vm0, %v344_v30  ;;  %1205 = vmatprep.mubr.msk.f32.mxu0 %vm368_vm0, %v362_v31 }
  0x36   : > { %1231 = vmatprep.mubr.msk.f32.mxu1 %vm368_vm0, %v345_v32  ;;  %800 = vperm.xlu1 %1350, %v766_v40  }
  0x37   : > { %795 = vperm.xlu0 %1349, %v765_v45  }
  0x38   : > { %1206 = vmatmul.mubr.msk.f32.gmra.mxu0 %vm368_vm0, %v363_v35 }
  0x39   : > { %1232 = vmatmul.mubr.msk.f32.gmra.mxu1 %vm368_vm0, %v346_v36  ;;  %1208 = vmatprep.mubr.msk.f32.mxu0 %vm368_vm0, %v364_v37 }
  0x3a   : > { %1234 = vmatprep.mubr.msk.f32.mxu1 %vm368_vm0, %v347_v38  ;;  %790 = vperm.xlu1 %1350, %v764_v46  }
  0x3b   : > { %785 = vperm.xlu0 %1349, %v763_v49  }
  0x3c   : > { %1209 = vmatmul.mubr.msk.f32.gmra.mxu0 %vm368_vm0, %v365_v41 }
  0x3d   : > { %1235 = vmatmul.mubr.msk.f32.gmra.mxu1 %vm368_vm0, %v348_v42  ;;  %1211 = vmatprep.mubr.msk.f32.mxu0 %vm368_vm0, %v366_v43 }
  0x3e   : > { %1237 = vmatprep.mubr.msk.f32.mxu1 %vm368_vm0, %v349_v44  ;;  %780 = vperm.xlu1 %1350, %v762_v50  }
  0x40   : > { %1212 = vmatmul.mubr.msk.f32.gmra.mxu0 %vm368_vm0, %v367_v47 }
  0x41   : > { %1238 = vmatmul.mubr.msk.f32.gmra.mxu1 %vm368_vm0, %v350_v48  ;;  %1272 = vmatprep.mubr.msk.f32.mxu0 %vm1451_vm2, %v1450_v51 }
  0x99   : > { %v856_v0 = vpop.permute.xlu0 %855  ;;  %v846_v3 = vpop.permute.xlu1 %845 }
  0x9d   : > { %v851_v9 = vpop.permute.xlu0 %850 }
  0xa1   : > { %v841_v12 = vpop.permute.xlu1 %840 }
  0xa2   : > { %v836_v17 = vpop.permute.xlu0 %835 }
  0xa5   : > { %v831_v20 = vpop.permute.xlu1 %830 }
  0xa6   : > { %v826_v25 = vpop.permute.xlu0 %825 }
  0xa9   : > { %v821_v33 = vpop.permute.xlu1 %820 }
  0xaa   : > { %v816_v41 = vpop.permute.xlu0 %815 }
  0xad   : > { %v811_v45 = vpop.permute.xlu1 %810 }
  0xe4   : > { %v1759_v52 = vpop.f32.mrf.mxu0 }
  0xe5   : > { %v1761_v53 = vpop.f32.mrf.mxu1 }
  0xe6   : > { %v1763_v54 = vpop.f32.mrf.mxu0 }
  0xe7   : > { %v1765_v55 = vpop.f32.mrf.mxu1 }
  0xe8   : > { %v1767_v56 = vpop.f32.mrf.mxu0 }
  0xe9   : > { %v1769_v57 = vpop.f32.mrf.mxu1 }
  0xea   : > { %v1771_v58 = vpop.f32.mrf.mxu0 }
  0xeb   : > { %v1773_v59 = vpop.f32.mrf.mxu1 }
  0xec   : > { %v1775_v60 = vpop.f32.mrf.mxu0 }
  0xed   : > { %v1777_v61 = vpop.f32.mrf.mxu1 }
  0xee   : > { %v1779_v62 = vpop.f32.mrf.mxu0 }
  0xef   : > { %v1781_v63 = vpop.f32.mrf.mxu1 }
  0xf0   : > { %v1201_v1 = vpop.f32.mrf.mxu0 }
  0xf1   : > { %v1227_v2 = vpop.f32.mrf.mxu1 }
  0xf2   : > { %v517_v5 = vpop.f32.mrf.mxu0  ;;  %v719_v49 = vadd.f32 %v1227_v2, %v1201_v1  ;;  %v704_v1 = vadd.f32 %v1781_v63, %v1779_v62  ;;  %v689_v63 = vadd.f32 %v1761_v53, %v1759_v52 }
  0xf3   : > { %v713_v6 = vpop.f32.mrf.mxu1 }
  0xf4   : > { %v1204_v7 = vpop.f32.mrf.mxu0 }
  0xf5   : > { %v1230_v8 = vpop.f32.mrf.mxu1 }
  0xf6   : > { %v527_v10 = vpop.f32.mrf.mxu0  ;;  %v729_v42 = vadd.f32 %v1230_v8, %v1204_v7  ;;  %v714_v7 = vadd.f32 %v713_v6, %v517_v5  ;;  %v699_v6 = vadd.f32 %v1769_v57, %v1767_v56  ;;  %v684_v57 = vadd.f32 %v1765_v55, %v1763_v54  ;;  %v890_v55 = vld [vmem:[%s1865_s5] sm:$0x1] }
  0xf7   : > { %v723_v11 = vpop.f32.mrf.mxu1 }
  0xf8   : > { %v1207_v13 = vpop.f32.mrf.mxu0  ;;  %v724_v46 = vadd.f32 %v723_v11, %v527_v10  ;;  %v867_v50 = vadd.f32 %v826_v25, %v729_v42  ;;  %v709_v10 = vadd.f32 %v1777_v61, %v1775_v60  ;;  %v865_v11 = vadd.f32 %v816_v41, %v719_v49 }
  0xf9   : > { %v1233_v14 = vpop.f32.mrf.mxu1  ;;  %v864_v2 = vadd.f32 %v811_v45, %v714_v7  ;;  %v694_v61 = vadd.f32 %v1773_v59, %v1771_v58 }
  0xfa   : > { %v537_v15 = vpop.f32.mrf.mxu0  ;;  %v739_v34 = vadd.f32 %v1233_v14, %v1207_v13  ;;  %v866_v8 = vadd.f32 %v821_v33, %v724_v46  ;;  %v883_v13 = vmax.f32 %v867_v50, 0.0 }
  0xfb   : > { %v733_v16 = vpop.f32.mrf.mxu1  ;;  %v880_v62 = vmax.f32 %v864_v2, 0.0 }
  0xfc   : > { %v1210_v18 = vpop.f32.mrf.mxu0  ;;  %v734_v38 = vadd.f32 %v733_v16, %v537_v15  ;;  %v869_v43 = vadd.f32 %v836_v17, %v739_v34  ;;  %v882_v14 = vmax.f32 %v866_v8, 0.0  ;;  %v881_v16 = vmax.f32 %v865_v11, 0.0 }
  0xfd   : > { %v1236_v19 = vpop.f32.mrf.mxu1 }
  0xfe   : > { %v547_v21 = vpop.f32.mrf.mxu0  ;;  %v749_v26 = vadd.f32 %v1236_v19, %v1210_v18  ;;  %v868_v47 = vadd.f32 %v831_v20, %v734_v38 }
  0xff   : > { %v743_v22 = vpop.f32.mrf.mxu1 }
 0x100   : > { %v1213_v23 = vpop.f32.mrf.mxu0  ;;  %v744_v30 = vadd.f32 %v743_v22, %v547_v21  ;;  %v871_v35 = vadd.f32 %v846_v3, %v749_v26  ;;  %v806_v3 = vpop.permute.xlu0 %805 }
 0x101   : > { %v1239_v24 = vpop.f32.mrf.mxu1  ;;  %v863_v15 = vadd.f32 %v806_v3, %v709_v10 }
 0x102   : > { %v759_v27 = vadd.f32 %v1239_v24, %v1213_v23  ;;  %v557_v28 = vpop.f32.mrf.mxu0  ;;  %v870_v39 = vadd.f32 %v841_v12, %v744_v30  ;;  %v887_v44 = vmax.f32 %v871_v35, 0.0  ;;  %v801_v12 = vpop.permute.xlu1 %800  ;;  %v892_v24 = vstv %s891_s13 }
 0x103   : > { %v753_v29 = vpop.f32.mrf.mxu1  ;;  %v862_v17 = vadd.f32 %v801_v12, %v704_v1  ;;  %v879_v19 = vmax.f32 %v863_v15, 0.0 }
 0x104   : > { %v873_v31 = vadd.f32 %v856_v0, %v759_v27  ;;  %v754_v32 = vadd.f32 %v753_v29, %v557_v28  ;;  %v886_v48 = vmax.f32 %v870_v39, 0.0  ;;  %v885_v0 = vmax.f32 %v869_v43, 0.0  ;;  %v796_v5 = vpop.permute.xlu0 %795 }
 0x105   : > { %v861_v18 = vadd.f32 %v796_v5, %v699_v6  ;;  %v878_v21 = vmax.f32 %v862_v17, 0.0 }
 0x106   : > { %v889_v36 = vmax.f32 %v873_v31, 0.0  ;;  %v872_v37 = vadd.f32 %v851_v9, %v754_v32  ;;  %v884_v9 = vmax.f32 %v868_v47, 0.0  ;;  %v791_v60 = vpop.permute.xlu1 %790  ;;  %v969_v31 = vlaneseq }
 0x107   : > { %v860_v20 = vadd.f32 %v791_v60, %v694_v61  ;;  %v877_v22 = vmax.f32 %v861_v18, 0.0 }
 0x108   : > { %v888_v40 = vmax.f32 %v872_v37, 0.0  ;;  %1241 = vmatpush3.msra.mxu0 %v889_v36  ;;  %v786_v56 = vpop.permute.xlu0 %785  ;;  %v970_v32 = vshrl.u32 %v969_v31, 7 }
 0x109   : > { %1242 = vmatprep.subr.mxu0 %v1450_v51  ;;  %v859_v59 = vadd.f32 %v786_v56, %v689_v63  ;;  %v876_v53 = vmax.f32 %v860_v20, 0.0 }
 0x10a   : > { %1243 = vmatpush3.msra.mxu0 %v888_v40  ;;  %v781_v58 = vpop.permute.xlu1 %780 }
 0x10b   : > { %1244 = vmatprep.subr.mxu0 %v1450_v51  ;;  %v858_v52 = vadd.f32 %v781_v58, %v684_v57  ;;  %v875_v23 = vmax.f32 %v859_v59, 0.0 }
 0x10c   : > { %1245 = vmatpush3.msra.mxu0 %v887_v44 }
 0x10d   : > { %1246 = vmatprep.subr.mxu0 %v1450_v51  ;;  %v874_v54 = vmax.f32 %v858_v52, 0.0 }
 0x10e   : > { %1247 = vmatpush3.msra.mxu0 %v886_v48 }
 0x10f   : > { %1248 = vmatprep.subr.mxu0 %v1450_v51 }
 0x110   : > { %1249 = vmatpush3.msra.mxu0 %v885_v0 }
 0x111   : > { %1250 = vmatprep.subr.mxu0 %v1450_v51 }
 0x112   : > { %1251 = vmatpush3.msra.mxu0 %v884_v9 }
 0x113   : > { %1252 = vmatprep.subr.mxu0 %v1450_v51 }
 0x114   : > { %1253 = vmatpush3.msra.mxu0 %v883_v13 }
 0x115   : > { %1254 = vmatprep.subr.mxu0 %v1450_v51 }
 0x116   : > { %1255 = vmatpush3.msra.mxu0 %v882_v14 }
 0x117   : > { %1256 = vmatprep.subr.mxu0 %v1450_v51 }
 0x118   : > { %1257 = vmatpush3.msra.mxu0 %v881_v16 }
 0x119   : > { %1258 = vmatprep.subr.mxu0 %v1450_v51 }
 0x11a   : > { %1259 = vmatpush3.msra.mxu0 %v880_v62 }
 0x11b   : > { %1260 = vmatprep.subr.mxu0 %v1450_v51 }
 0x11c   : > { %1261 = vmatpush3.msra.mxu0 %v879_v19 }
 0x11d   : > { %1262 = vmatprep.subr.mxu0 %v1450_v51 }
 0x11e   : > { %1263 = vmatpush3.msra.mxu0 %v878_v21 }
 0x11f   : > { %1264 = vmatprep.subr.mxu0 %v1450_v51 }
 0x120   : > { %1265 = vmatpush3.msra.mxu0 %v877_v22 }
 0x121   : > { %1266 = vmatprep.subr.mxu0 %v1450_v51 }
 0x122   : > { %1267 = vmatpush3.msra.mxu0 %v876_v53 }
 0x123   : > { %1268 = vmatprep.subr.mxu0 %v1450_v51 }
 0x124   : > { %1269 = vmatpush3.msra.mxu0 %v875_v23 }
 0x125   : > { %1270 = vmatprep.subr.mxu0 %v1450_v51  ;;  %v971_v51 = vsub.s32 0, %v970_v32 }
 0x126   : > { %1271 = vmatpush3.msra.mxu0 %v874_v54 }
 0x127   : > { %1273 = vmatmul.mubr.f32.vlgmr.msra.gmra.mxu0 %v890_v55 }
 0x1e7   : > { %v959_v25 = vpop.f32.mrf.mxu0 }
 0x1e8   : > { %v960_v26 = vadd.f32 %v959_v25, %v892_v24 }
 0x1e9   : > { %v1274_v27 = vpop.f32.mrf.mxu0 }
 0x1ea   : > { %v1131_v28 = vmul.f32 -1.442695, %v960_v26 }
 0x1ec   : > { %1351 = vpow2.f32 %v1131_v28 }
 0x1f9   : > { %v1352_v29 = vpop.eup %1351 }
 0x1fa   : > { %v966_v30 = vadd.f32 1.0, %v1352_v29 }
 0x1fc   : > { %1353 = vrcp.f32 %v966_v30 }
 0x209   : > { %v1354_v33 = vpop.eup %1353 }
 0x20a   : > { %v972_v34 = vrot.slane %v1354_v33, %v971_v51 }
 0x20c   : > { %v973_v35 = vmul.f32 %v972_v34, %v1588_v4 }
 0x20e   : > { %974 = vst [vmem:[%s317_s24] sm:$0xf] %v973_v35 }
 0x20f   : > { %1368 = shalt.err (!%p1365_p7)
}
 0x210   : > { %s1369_s13 = scalar_lea.hbm %s989_s14, 64  ;;  %s1373_s21 = scalar_lea.hbm %s1867_s7, 256 }
 0x211   : > { %p1370_p9 = scmp.ne.s32.totalorder %s989_s14, %s1369_s13  ;;  %p1374_p12 = scmp.lt.s32.totalorder %s989_s14, %s1867_s7 }
 0x212   : > { %p1375_p13 = scmp.lt.s32.totalorder %s1373_s21, %s1369_s13 }
 0x213   : > { %p1371_p10 = pnand %p1370_p9, %p1547_p3 }
 0x214   : > { %p1376_p0 = por %p1375_p13, %p1374_p12 }
 0x215   : > { %p1372_p11 = pneg %p1371_p10 }
 0x217   : > { %p1377_p1 = pnand %p1376_p0, %p1372_p11 }
 0x219   : > { %1380 = shalt.err (!%p1377_p1)
}
 0x21a   : > { %1275 = dma.vmem_to_hbm [thread:$0]  (%p1547_p3), %s992_s25, 64, %s989_s14, %s976_s17  }
 0x21b PF: > { %p1281_p2 = scmp.ge.s32.totalorder %s1447_s10, 2  ;;  %s1003_s24 = sand.u32 1, %s1419_s26  }
 0x21c   : > { %s1004_s6 = scalar_lea.sflag [#allocation4], %s1003_s24 }
 0x21d   : > { %p1278_p4 = pnand %p1281_p2, %p1556_p8 }
 0x21f   : > { %p1279_p5 = pneg %p1278_p4 }
 0x221   : > { %1414 = dma.done.wait (%p1279_p5), %s1004_s6, 64  }
 0x222   : > { %1416 = vsyncadd (%p1279_p5), %s1004_s6, 4294967232  ;;  %s21_s10 = sadd.s32 1, %s1447_s10   ;;  %s1876_s30 = sld [smem:[#allocation6_spill]] }
 0x223   : > { %p18_p6 = scmp.ge.s32.totalorder %s21_s10, 6   ;;  %s1877_s15 = sld [smem:[#allocation7_spill]] }
 0x224   : > { %s1878_s9 = sld [smem:[#allocation8_spill]]  ;;  %s1879_s26 = smov %s1423_s27 }
 0x225   : > { %s1880_s27 = smov %s1427_s28  ;;  %s1881_s28 = smov %s1565_s20 }
 0x226   : > { %s1882_s29 = smov %s1439_s8  ;;  %20 = sbr.rel (!%p18_p6) target bundleno = 7 (0x7), region = 86 }
 0x229   : > { %s1883_s8 = smov %s1877_s15 }
 0x22b   :  { %1009 = vsyncpa [#allocation4], 1 }
 0x22c   :  { %1011 = vsyncpa [#allocation4 + $0x1], 1 }

</bundles_post_ra>
